<compile_context>
chip_gen: v7x
topology: tpu7x:2x2x1
jax: 0.10.0
libtpu: 0.0.40
codegen_flags: <defaults>
</compile_context>

<pallas_src>
import functools

import jax
import jax.numpy as jnp
from jax.experimental import pallas as pl
from jax.experimental.pallas import tpu as pltpu


def _round_up(x, m):
    return (x + m - 1) // m * m


def _ppo_kernel(x_ref, w1_ref, b1_ref, w2_ref, b2_ref, wh_ref, bh_ref, out_ref):
    # x tile: (TM, in_dim) bf16; weights bf16; biases f32; out: (TM, NH_PAD) f32.
    x = x_ref[...]

    # Linear(in_dim, 256) + ReLU   (bf16 MXU, f32 accumulate, f32 elementwise)
    h1 = jnp.dot(x, w1_ref[...], preferred_element_type=jnp.float32)
    h1 = jnp.maximum(h1 + b1_ref[...], 0.0)

    # Linear(256, 128) + ReLU
    h2 = jnp.dot(h1.astype(jnp.bfloat16), w2_ref[...],
                 preferred_element_type=jnp.float32)
    h2 = jnp.maximum(h2 + b2_ref[...], 0.0)

    # Shared Tanh, then fused + lane-padded [logits | value | zeros] head.
    # Tanh/bias/ReLU kept in f32 (v5e has no bf16 VPU/EUP); switch to bf16 on
    # v6e/v7x only if a bundle profile shows EUP/VALU binding, not the MXU.
    t = jnp.tanh(h2)
    out = jnp.dot(t.astype(jnp.bfloat16), wh_ref[...],
                  preferred_element_type=jnp.float32)
    out_ref[...] = out + bh_ref[...]


@functools.partial(jax.jit, static_argnames=("out_dim", "block_m"))
def ppo_forward(obs, params, out_dim, block_m=2048):
    """obs: (B, X, in_dim, Z) float32 -> (logits, value).

    logits: (B, Z, X, out_dim), value: (B, Z, X, 1) (matches torch forward /
    value_function before squeeze).
    """
    w1, b1, w2, b2, w3, b3, wv, bv = params
    B, X, in_dim, Z = obs.shape
    nh = out_dim + 1                         # logits columns + 1 value column
    nh_pad = _round_up(nh, 128)              # lane-dense output width

    # Fuse the two heads, zero-pad to a lane-dense width, cast weights to bf16
    # for the MXU (biases stay f32).
    w1b = w1.astype(jnp.bfloat16)
    w2b = w2.astype(jnp.bfloat16)
    wh = jnp.concatenate([w3, wv], axis=1)                       # (128, nh)
    wh = jnp.pad(wh, ((0, 0), (0, nh_pad - nh))).astype(jnp.bfloat16)
    bh = jnp.pad(jnp.concatenate([b3, bv], axis=1),
                 ((0, 0), (0, nh_pad - nh))).astype(jnp.float32)  # (1, nh_pad)

    # permute(0,3,1,2) + flatten rows.  (One extra HBM pass - see header TODO.)
    sym = jnp.transpose(obs, (0, 3, 1, 2))
    M = B * Z * X
    x2d = sym.reshape(M, in_dim).astype(jnp.bfloat16)

    # Row tiling: multiple of 16 (bf16 sublane packing); ragged last block is
    # handled by Pallas (no full-array pad).
    tm = min(block_m, _round_up(M, 16))
    # v7x megacore: prefer >= 2 grid steps so both TensorCores get work.
    if M > 512 and pl.cdiv(M, tm) < 2:
        tm = max(256, _round_up(pl.cdiv(M, 2), 16))
    m_rows = M
    if tm > M:
        # Single-block case only: tiny (< 16 row) pad up to the block size.
        x2d = jnp.pad(x2d, ((0, tm - M), (0, 0)))
        m_rows = tm
    grid = (pl.cdiv(m_rows, tm),)

    # Constant index_map => weights/biases stay resident in VMEM across steps.
    def _resident(arr):
        return pl.BlockSpec(arr.shape, lambda i: (0, 0))

    cost = pl.CostEstimate(
        flops=2 * m_rows * (in_dim * 256 + 256 * 128 + 128 * nh_pad),
        transcendentals=m_rows * 128,
        bytes_accessed=(2 * m_rows * in_dim + 4 * m_rows * nh_pad
                        + 2 * (in_dim * 256 + 256 * 128 + 128 * nh_pad)
                        + 4 * (256 + 128 + nh_pad)),
    )

    out2d = pl.pallas_call(
        _ppo_kernel,
        out_shape=jax.ShapeDtypeStruct((m_rows, nh_pad), jnp.float32),
        grid=grid,
        in_specs=[
            pl.BlockSpec((tm, in_dim), lambda i: (i, 0)),
            _resident(w1b), _resident(b1),
            _resident(w2b), _resident(b2),
            _resident(wh), _resident(bh),
        ],
        out_specs=pl.BlockSpec((tm, nh_pad), lambda i: (i, 0)),
        compiler_params=pltpu.CompilerParams(
            dimension_semantics=("parallel",)),
        cost_estimate=cost,
    )(x2d, w1b, b1, w2b, b2, wh, bh)

    out4d = out2d[:M, :nh].reshape(B, Z, X, nh)
    logits = out4d[..., :out_dim]
    value = out4d[..., out_dim:]
    return logits, value


def init_params(key, in_dim, out_dim):
    """Deterministic synthetic params.  Weights stored as (in, out)."""
    ks = jax.random.split(key, 8)

    def lin(kw, kb, fan_in, fan_out):
        bound = 1.0 / jnp.sqrt(jnp.float32(fan_in))
        w = jax.random.uniform(kw, (fan_in, fan_out), jnp.float32, -bound, bound)
        b = jax.random.uniform(kb, (1, fan_out), jnp.float32, -bound, bound)
        return w, b

    w1, b1 = lin(ks[0], ks[1], in_dim, 256)
    w2, b2 = lin(ks[2], ks[3], 256, 128)
    w3, b3 = lin(ks[4], ks[5], 128, out_dim)
    wv, bv = lin(ks[6], ks[7], 128, 1)
    return (w1, b1, w2, b2, w3, b3, wv, bv)


def _reference(obs, params):
    """Pure-JAX f32 reference matching the PyTorch module."""
    w1, b1, w2, b2, w3, b3, wv, bv = params
    sym = jnp.transpose(obs, (0, 3, 1, 2))
    h = jnp.maximum(sym @ w1 + b1[0], 0.0)
    h = jnp.maximum(h @ w2 + b2[0], 0.0)
    t = jnp.tanh(h)
    return t @ w3 + b3[0], t @ wv + bv[0]


if __name__ == "__main__":
    B, X, in_dim, Z = 2, 16, 32, 8          # M = B*Z*X = 256 rows
    out_dim = 6

    key = jax.random.PRNGKey(0)
    k_obs, k_par = jax.random.split(key)
    obs = jax.random.normal(k_obs, (B, X, in_dim, Z), dtype=jnp.float32)
    params = init_params(k_par, in_dim, out_dim)

    ref_logits, ref_value = _reference(obs, params)

    # Default tiling (single block for this small M).
    logits, value = ppo_forward(obs, params, out_dim)
    jax.block_until_ready((logits, value))
    assert logits.shape == (B, Z, X, out_dim)
    assert value.shape == (B, Z, X, 1)
    # bf16 MXU inputs with f32 accumulation -> loosened tolerance vs f32 ref.
    assert jnp.allclose(logits, ref_logits, atol=5e-2, rtol=5e-2), (
        float(jnp.max(jnp.abs(logits - ref_logits))))
    assert jnp.allclose(value, ref_value, atol=5e-2, rtol=5e-2), (
        float(jnp.max(jnp.abs(value - ref_value))))

    # Smaller tile -> multi-step grid with a ragged final block (exercises the
    # no-pad path and megacore "parallel" sharding).
    logits2, value2 = ppo_forward(obs, params, out_dim, block_m=96)
    jax.block_until_ready((logits2, value2))
    assert jnp.allclose(logits2, ref_logits, atol=5e-2, rtol=5e-2), (
        float(jnp.max(jnp.abs(logits2 - ref_logits))))
    assert jnp.allclose(value2, ref_value, atol=5e-2, rtol=5e-2), (
        float(jnp.max(jnp.abs(value2 - ref_value))))

    print("KERNEL_OK")
</pallas_src>

<mosaic_0001>
module attributes {stable_mosaic.version = 11 : i64} {
  func.func @_ppo_kernel(%arg0: i32, %arg1: memref<256x32xbf16, #tpu.memory_space<vmem>>, %arg2: memref<32x256xbf16, #tpu.memory_space<vmem>>, %arg3: memref<1x256xf32, #tpu.memory_space<vmem>>, %arg4: memref<256x128xbf16, #tpu.memory_space<vmem>>, %arg5: memref<1x128xf32, #tpu.memory_space<vmem>>, %arg6: memref<128x128xbf16, #tpu.memory_space<vmem>>, %arg7: memref<1x128xf32, #tpu.memory_space<vmem>>, %arg8: memref<256x128xf32, #tpu.memory_space<vmem>>) attributes {dimension_semantics = [#tpu.dimension_semantics<parallel>], iteration_bounds = array<i64: 1>, scalar_prefetch = 0 : i64, scratch_operands = 0 : i64, tpu.core_type = #tpu.core_type<tc>, window_params = [{transform_indices = @transform_0, window_bounds = array<i64: 256, 32>}, {pipeline_mode = #tpu.pipeline_mode<synchronous>, transform_indices = @transform_1, window_bounds = array<i64: 32, 256>}, {pipeline_mode = #tpu.pipeline_mode<synchronous>, transform_indices = @transform_2, window_bounds = array<i64: 1, 256>}, {pipeline_mode = #tpu.pipeline_mode<synchronous>, transform_indices = @transform_3, window_bounds = array<i64: 256, 128>}, {pipeline_mode = #tpu.pipeline_mode<synchronous>, transform_indices = @transform_4, window_bounds = array<i64: 1, 128>}, {pipeline_mode = #tpu.pipeline_mode<synchronous>, transform_indices = @transform_5, window_bounds = array<i64: 128, 128>}, {pipeline_mode = #tpu.pipeline_mode<synchronous>, transform_indices = @transform_6, window_bounds = array<i64: 1, 128>}, {transform_indices = @transform_7, window_bounds = array<i64: 256, 128>}]} {
    %c0 = arith.constant 0 : index
    %c0_0 = arith.constant 0 : index
    %0 = vector.load %arg1[%c0, %c0_0] : memref<256x32xbf16, #tpu.memory_space<vmem>>, vector<256x32xbf16>
    %c0_1 = arith.constant 0 : index
    %c0_2 = arith.constant 0 : index
    %1 = vector.load %arg2[%c0_1, %c0_2] : memref<32x256xbf16, #tpu.memory_space<vmem>>, vector<32x256xbf16>
    %cst = arith.constant dense<0.000000e+00> : vector<256x256xf32>
    %2 = tpu.matmul %0, %1, %cst {dimension_numbers = #tpu.dot_dimension_numbers<[1], [0], [0], [1], [0, 0, 1, 1], [], []>} : vector<256x32xbf16>, vector<32x256xbf16>, vector<256x256xf32> -> vector<256x256xf32>
    %c0_3 = arith.constant 0 : index
    %c0_4 = arith.constant 0 : index
    %3 = vector.load %arg3[%c0_3, %c0_4] : memref<1x256xf32, #tpu.memory_space<vmem>>, vector<1x256xf32>
    %4 = vector.broadcast %3 : vector<1x256xf32> to vector<256x256xf32>
    %5 = arith.addf %2, %4 : vector<256x256xf32>
    %cst_5 = arith.constant 0.000000e+00 : f32
    %6 = vector.broadcast %cst_5 : f32 to vector<256x256xf32>
    %7 = arith.maximumf %5, %6 : vector<256x256xf32>
    %8 = arith.truncf %7 : vector<256x256xf32> to vector<256x256xbf16>
    %c0_6 = arith.constant 0 : index
    %c0_7 = arith.constant 0 : index
    %9 = vector.load %arg4[%c0_6, %c0_7] : memref<256x128xbf16, #tpu.memory_space<vmem>>, vector<256x128xbf16>
    %cst_8 = arith.constant dense<0.000000e+00> : vector<256x128xf32>
    %10 = tpu.matmul %8, %9, %cst_8 {dimension_numbers = #tpu.dot_dimension_numbers<[1], [0], [0], [1], [0, 0, 1, 1], [], []>} : vector<256x256xbf16>, vector<256x128xbf16>, vector<256x128xf32> -> vector<256x128xf32>
    %c0_9 = arith.constant 0 : index
    %c0_10 = arith.constant 0 : index
    %11 = vector.load %arg5[%c0_9, %c0_10] : memref<1x128xf32, #tpu.memory_space<vmem>>, vector<1x128xf32>
    %12 = vector.broadcast %11 : vector<1x128xf32> to vector<256x128xf32>
    %13 = arith.addf %10, %12 : vector<256x128xf32>
    %cst_11 = arith.constant 0.000000e+00 : f32
    %14 = vector.broadcast %cst_11 : f32 to vector<256x128xf32>
    %15 = arith.maximumf %13, %14 : vector<256x128xf32>
    %16 = math.tanh %15 : vector<256x128xf32>
    %17 = arith.truncf %16 : vector<256x128xf32> to vector<256x128xbf16>
    %c0_12 = arith.constant 0 : index
    %c0_13 = arith.constant 0 : index
    %18 = vector.load %arg6[%c0_12, %c0_13] : memref<128x128xbf16, #tpu.memory_space<vmem>>, vector<128x128xbf16>
    %cst_14 = arith.constant dense<0.000000e+00> : vector<256x128xf32>
    %19 = tpu.matmul %17, %18, %cst_14 {dimension_numbers = #tpu.dot_dimension_numbers<[1], [0], [0], [1], [0, 0, 1, 1], [], []>} : vector<256x128xbf16>, vector<128x128xbf16>, vector<256x128xf32> -> vector<256x128xf32>
    %c0_15 = arith.constant 0 : index
    %c0_16 = arith.constant 0 : index
    %20 = vector.load %arg7[%c0_15, %c0_16] : memref<1x128xf32, #tpu.memory_space<vmem>>, vector<1x128xf32>
    %21 = vector.broadcast %20 : vector<1x128xf32> to vector<256x128xf32>
    %22 = arith.addf %19, %21 : vector<256x128xf32>
    %c0_17 = arith.constant 0 : index
    %c0_18 = arith.constant 0 : index
    %23 = vector.load %arg8[%c0_17, %c0_18] : memref<256x128xf32, #tpu.memory_space<vmem>>, vector<256x128xf32>
    tpu.vector_store %arg8[%c0_17, %c0_18], %22 {strides = array<i32>} : memref<256x128xf32, #tpu.memory_space<vmem>>, vector<256x128xf32>,
    return
  }
  func.func @transform_0(%arg0: i32) -> (i32, i32) {
    %c0_i32 = arith.constant 0 : i32
    %c0_i32_0 = arith.constant 0 : i32
    return %arg0, %c0_i32 : i32, i32
  }
  func.func @transform_1(%arg0: i32) -> (i32, i32) {
    %c0_i32 = arith.constant 0 : i32
    %c0_i32_0 = arith.constant 0 : i32
    %c0_i32_1 = arith.constant 0 : i32
    return %c0_i32, %c0_i32_0 : i32, i32
  }
  func.func @transform_2(%arg0: i32) -> (i32, i32) {
    %c0_i32 = arith.constant 0 : i32
    %c0_i32_0 = arith.constant 0 : i32
    %c0_i32_1 = arith.constant 0 : i32
    return %c0_i32, %c0_i32_0 : i32, i32
  }
  func.func @transform_3(%arg0: i32) -> (i32, i32) {
    %c0_i32 = arith.constant 0 : i32
    %c0_i32_0 = arith.constant 0 : i32
    %c0_i32_1 = arith.constant 0 : i32
    return %c0_i32, %c0_i32_0 : i32, i32
  }
  func.func @transform_4(%arg0: i32) -> (i32, i32) {
    %c0_i32 = arith.constant 0 : i32
    %c0_i32_0 = arith.constant 0 : i32
    %c0_i32_1 = arith.constant 0 : i32
    return %c0_i32, %c0_i32_0 : i32, i32
  }
  func.func @transform_5(%arg0: i32) -> (i32, i32) {
    %c0_i32 = arith.constant 0 : i32
    %c0_i32_0 = arith.constant 0 : i32
    %c0_i32_1 = arith.constant 0 : i32
    return %c0_i32, %c0_i32_0 : i32, i32
  }
  func.func @transform_6(%arg0: i32) -> (i32, i32) {
    %c0_i32 = arith.constant 0 : i32
    %c0_i32_0 = arith.constant 0 : i32
    %c0_i32_1 = arith.constant 0 : i32
    return %c0_i32, %c0_i32_0 : i32, i32
  }
  func.func @transform_7(%arg0: i32) -> (i32, i32) {
    %c0_i32 = arith.constant 0 : i32
    %c0_i32_0 = arith.constant 0 : i32
    return %arg0, %c0_i32 : i32, i32
  }
}

</mosaic_0001>

<bundles_post_ra>
// kernel: ppo_forward.1
= control target key start
LH: loop header
LB: loop body
LE: loop exit
PB: predicated region body
PF: predicated region fallthrough
CT: control target
= control target key end

     0   :  { %v1518_v1 = vmov 0   ;;  %vm175_vm0 = vcmask 261120   ;;  %v65_v37 = vlaneseq  ;;  %s1988_s1 = inlined_call_operand.vmem [shape: bf16[32,256], index: 1, kind: input, shape index: {}]   ;;  %s1989_s0 = inlined_call_operand.vmem [shape: bf16[256,32], index: 0, kind: input, shape index: {}]   ;;  %s1990_s3 = inlined_call_operand.vmem [shape: bf16[256,128], index: 3, kind: input, shape index: {}]   ;;  %s1991_s2 = inlined_call_operand.vmem [shape: f32[1,256], index: 2, kind: input, shape index: {}]   ;;  %s1992_s5 = inlined_call_operand.vmem [shape: bf16[128,128], index: 5, kind: input, shape index: {}]   ;;  %s1993_s4 = inlined_call_operand.vmem [shape: f32[1,128], index: 4, kind: input, shape index: {}]   ;;  %s1994_s6 = inlined_call_operand.vmem [shape: f32[1,128], index: 6, kind: input, shape index: {}]   ;;  %s1995_s7 = inlined_call_operand.vmem [shape: f32[256,128], index: 7, kind: output, shape index: {}]  }
   0x1   :  { %v1408_v0 = vld [vmem:[%s1988_s1 + $0x4] ss:$8 sps:$4 sm:$0xff]   ;;  %256 = vmatprep.mubr.bf16.mxu0 %v1518_v1  ;;  %376 = vmatprep.mubr.bf16.mxu1 %v1518_v1  ;;  %v1410_v2 = vld [vmem:[%s1988_s1] ss:$8 sps:$4 sm:$0xff]   ;;  %v1411_v3 = vld [vmem:[%s1988_s1 + $0x14] ss:$8 sps:$4 sm:$0xff]  }
   0x2   :  { %224 = vmatprep.subr.bf16.mxu0 %v1408_v0  ;;  %1403 = vmatprep.subr.bf16.mxu1 %v1408_v0  ;;  %v1413_v4 = vld [vmem:[%s1988_s1 + $0x10] ss:$8 sps:$4 sm:$0xff]   ;;  %v1414_v5 = vld [vmem:[%s1989_s0] sm:$0xff]   ;;  %v1415_v6 = vld [vmem:[%s1989_s0 + $0x8] sm:$0xff]   ;;  %v66_v38 = vshrl.u32 %v65_v37, 7 }
   0x3   :  { %225 = vmatpush1.bf16.msra.mxu0 %v1410_v2  ;;  %1405 = vmatpush1.bf16.msra.mxu1 %v1410_v2  ;;  %v1426_v7 = vld [vmem:[%s1989_s0 + $0x60] sm:$0xff]   ;;  %v1427_v8 = vld [vmem:[%s1989_s0 + $0x68] sm:$0xff]   ;;  %v1416_v12 = vld [vmem:[%s1989_s0 + $0x10] sm:$0xff]  }
   0x4   :  { %226 = vmatprep.subr.bf16.mxu0 %v1411_v3  ;;  %1404 = vmatprep.subr.bf16.mxu1 %v1411_v3  ;;  %v1430_v9 = vld [vmem:[%s1990_s3 + $0x40] sm:$0xff]   ;;  %v1432_v11 = vld [vmem:[%s1990_s3 + $0x48] sm:$0xff]   ;;  %v1434_v14 = vld [vmem:[%s1990_s3 + $0x50] sm:$0xff]   ;;  %v67_v39 = vsub.s32 0, %v66_v38  ;;  %v71_v41 = vsub.s32 1, %v66_v38 }
   0x5   :  { %v1431_v10 = vld [vmem:[%s1990_s3] sm:$0xff]   ;;  %v1433_v13 = vld [vmem:[%s1990_s3 + $0x8] sm:$0xff]   ;;  %v1435_v15 = vld [vmem:[%s1990_s3 + $0x10] sm:$0xff]  }
   0x6   :  { %v1417_v16 = vld [vmem:[%s1989_s0 + $0x18] sm:$0xff]   ;;  %v1428_v18 = vld [vmem:[%s1989_s0 + $0x70] sm:$0xff]   ;;  %v1438_v20 = vld [vmem:[%s1990_s3 + $0x60] sm:$0xff]  }
   0x7   :  { %227 = vmatpush1.bf16.msra.mxu0 %v1413_v4  ;;  %1406 = vmatpush1.bf16.msra.mxu1 %v1413_v4  ;;  %v1436_v17 = vld [vmem:[%s1990_s3 + $0x58] sm:$0xff]   ;;  %v1439_v21 = vld [vmem:[%s1990_s3 + $0x20] sm:$0xff]   ;;  %v1440_v22 = vld [vmem:[%s1990_s3 + $0x68] sm:$0xff]  }
   0x8   :  { %1219 = vmatprep.subr.bf16.mxu1 %v1430_v9  ;;  %v1437_v19 = vld [vmem:[%s1990_s3 + $0x18] sm:$0xff]   ;;  %v1418_v24 = vld [vmem:[%s1989_s0 + $0x20] sm:$0xff]   ;;  %v1441_v25 = vld [vmem:[%s1990_s3 + $0x28] sm:$0xff]  }
   0x9   :  { %v1429_v23 = vld [vmem:[%s1989_s0 + $0x78] sm:$0xff]   ;;  %v1419_v26 = vld [vmem:[%s1989_s0 + $0x28] sm:$0xff]   ;;  %v1420_v27 = vld [vmem:[%s1989_s0 + $0x30] sm:$0xff]  }
   0xa   :  { %1177 = vmatmul.mubr.msk.bf16.vlgmr.msra.gmra.mrb[0].mxu0 %vm175_vm0, %v1414_v5  ;;  %1189 = vmatmul.mubr.msk.bf16.vlgmr.msra.gmra.mrb[0].mxu1 %vm175_vm0, %v1426_v7  ;;  %v1421_v28 = vld [vmem:[%s1989_s0 + $0x38] sm:$0xff]   ;;  %v1422_v29 = vld [vmem:[%s1989_s0 + $0x40] sm:$0xff]   ;;  %v1423_v30 = vld [vmem:[%s1989_s0 + $0x48] sm:$0xff]  }
   0xb   :  { %266 = vmatprep.mubr.bf16.mxu0 %v1518_v1  ;;  %386 = vmatprep.mubr.bf16.mxu1 %v1518_v1  ;;  %v1424_v31 = vld [vmem:[%s1989_s0 + $0x50] sm:$0xff]   ;;  %v1425_v32 = vld [vmem:[%s1989_s0 + $0x58] sm:$0xff]   ;;  %v63_v40 = vld [vmem:[%s1991_s2] sm:$0x3] }
   0xc   :  { %1220 = vmatpush3.bf16.msra.mxu1 %v1431_v10  ;;  %v1442_v33 = vld [vmem:[%s1990_s3 + $0x70] sm:$0xff]   ;;  %v1444_v35 = vld [vmem:[%s1990_s3 + $0x78] sm:$0xff]   ;;  %v1702_v42 = vrot.slane %v63_v40, %v67_v39  ;;  %v1704_v43 = vrot.slane %v63_v40, %v71_v41  ;;  %v1446_v52 = vld [vmem:[%s1992_s5] sm:$0xff]  }
   0xd   :  { %1221 = vmatprep.subr.bf16.mxu1 %v1432_v11  ;;  %v1443_v34 = vld [vmem:[%s1990_s3 + $0x30] sm:$0xff]   ;;  %v1445_v36 = vld [vmem:[%s1990_s3 + $0x38] sm:$0xff]   ;;  %1355 = vmatprep.subr.bf16.mxu0 %v1446_v52 }
   0xe   :  { %1356 = vmatpush3.bf16.msra.mxu0 %v1446_v52 }
  0x10   :  { %1222 = vmatpush3.bf16.msra.mxu1 %v1433_v13 }
  0x11   :  { %1223 = vmatprep.subr.bf16.mxu1 %v1434_v14 }
  0x12   :  { %1178 = vmatmul.mubr.msk.bf16.gmra.mrb[4].mxu0 %vm175_vm0, %v1415_v6  ;;  %1190 = vmatmul.mubr.msk.bf16.gmra.mrb[4].mxu1 %vm175_vm0, %v1427_v8 }
  0x13   :  { %276 = vmatprep.mubr.bf16.mxu0 %v1518_v1  ;;  %396 = vmatprep.mubr.bf16.mxu1 %v1518_v1 }
  0x14   :  { %1224 = vmatpush3.bf16.msra.mxu1 %v1435_v15 }
  0x15   :  { %1225 = vmatprep.subr.bf16.mxu1 %v1436_v17 }
  0x18   :  { %1226 = vmatpush3.bf16.msra.mxu1 %v1437_v19 }
  0x19   :  { %1227 = vmatprep.subr.bf16.mxu1 %v1438_v20 }
  0x1a   :  { %1179 = vmatmul.mubr.msk.bf16.gmra.mrb[8].mxu0 %vm175_vm0, %v1416_v12  ;;  %1191 = vmatmul.mubr.msk.bf16.gmra.mrb[8].mxu1 %vm175_vm0, %v1428_v18 }
  0x1b   :  { %286 = vmatprep.mubr.bf16.mxu0 %v1518_v1  ;;  %406 = vmatprep.mubr.bf16.mxu1 %v1518_v1 }
  0x1c   :  { %1228 = vmatpush3.bf16.msra.mxu1 %v1439_v21 }
  0x1d   :  { %1229 = vmatprep.subr.bf16.mxu1 %v1440_v22 }
  0x20   :  { %1230 = vmatpush3.bf16.msra.mxu1 %v1441_v25 }
  0x21   :  { %1231 = vmatprep.subr.bf16.mxu1 %v1442_v33 }
  0x22   :  { %1180 = vmatmul.mubr.msk.bf16.gmra.mrb[12].mxu0 %vm175_vm0, %v1417_v16  ;;  %1192 = vmatmul.mubr.msk.bf16.gmra.mrb[12].mxu1 %vm175_vm0, %v1429_v23 }
  0x23   :  { %296 = vmatprep.mubr.bf16.mxu0 %v1518_v1 }
  0x24   :  { %1232 = vmatpush3.bf16.msra.mxu1 %v1443_v34 }
  0x25   :  { %1233 = vmatprep.subr.bf16.mxu1 %v1444_v35 }
  0x28   :  { %1234 = vmatpush3.bf16.msra.mxu1 %v1445_v36 }
  0x2a   :  { %1181 = vmatmul.mubr.msk.bf16.gmra.mrb[16].mxu0 %vm175_vm0, %v1418_v24 }
  0x2b   :  { %306 = vmatprep.mubr.bf16.mxu0 %v1518_v1 }
  0x32   :  { %1182 = vmatmul.mubr.msk.bf16.gmra.mrb[20].mxu0 %vm175_vm0, %v1419_v26 }
  0x33   :  { %316 = vmatprep.mubr.bf16.mxu0 %v1518_v1 }
  0x3a   :  { %1183 = vmatmul.mubr.msk.bf16.gmra.mrb[24].mxu0 %vm175_vm0, %v1420_v27 }
  0x3b   :  { %326 = vmatprep.mubr.bf16.mxu0 %v1518_v1 }
  0x42   :  { %1184 = vmatmul.mubr.msk.bf16.gmra.mrb[28].mxu0 %vm175_vm0, %v1421_v28 }
  0x43   :  { %336 = vmatprep.mubr.bf16.mxu0 %v1518_v1 }
  0x4a   :  { %1185 = vmatmul.mubr.msk.bf16.gmra.mrb[32].mxu0 %vm175_vm0, %v1422_v29 }
  0x4b   :  { %346 = vmatprep.mubr.bf16.mxu0 %v1518_v1 }
  0x52   :  { %1186 = vmatmul.mubr.msk.bf16.gmra.mrb[36].mxu0 %vm175_vm0, %v1423_v30 }
  0x53   :  { %356 = vmatprep.mubr.bf16.mxu0 %v1518_v1 }
  0x5a   :  { %1187 = vmatmul.mubr.msk.bf16.gmra.mrb[40].mxu0 %vm175_vm0, %v1424_v31 }
  0x5b   :  { %366 = vmatprep.mubr.bf16.mxu0 %v1518_v1 }
  0x62   :  { %1188 = vmatmul.mubr.msk.bf16.gmra.mrb[44].mxu0 %vm175_vm0, %v1425_v32 }
  0xdd   :  { %v258_v44 = vpop.f32.mrb[0].mxu0  ;;  %v378_v58 = vpop.f32.mrb[0].mxu1 }
  0xde   :  { %v259_v45 = vadd.f32 %v258_v44, %v1702_v42  ;;  %v260_v46 = vpop.f32.mrb[1].mxu0  ;;  %v379_v61 = vadd.f32 %v378_v58, %v1702_v42  ;;  %v380_v62 = vpop.f32.mrb[1].mxu1 }
  0xdf   :  { %v261_v47 = vadd.f32 %v260_v46, %v1704_v43  ;;  %v262_v48 = vpop.f32.mrb[2].mxu0  ;;  %v381_v1 = vadd.f32 %v380_v62, %v1704_v43  ;;  %v382_v2 = vpop.f32.mrb[2].mxu1 }
  0xe0   :  { %v263_v49 = vadd.f32 %v262_v48, %v1702_v42  ;;  %v264_v50 = vpop.f32.mrb[3].mxu0  ;;  %v417_v53 = vmax.f32 %v259_v45, 0.0  ;;  %v465_v5 = vmax.f32 %v379_v61, 0.0  ;;  %v383_v6 = vadd.f32 %v382_v2, %v1702_v42  ;;  %v384_v7 = vpop.f32.mrb[3].mxu1 }
  0xe1   :  { %v265_v51 = vadd.f32 %v264_v50, %v1704_v43  ;;  %v418_v55 = vmax.f32 %v261_v47, 0.0  ;;  %v466_v10 = vmax.f32 %v381_v1, 0.0  ;;  %v385_v11 = vadd.f32 %v384_v7, %v1704_v43 }
  0xe2   :  { %v419_v54 = vmax.f32 %v263_v49, 0.0  ;;  %v467_v13 = vmax.f32 %v383_v6, 0.0 }
  0xe3   :  { %v420_v56 = vmax.f32 %v265_v51, 0.0  ;;  %v468_v16 = vmax.f32 %v385_v11, 0.0 }
  0xe4   :  { %v481_v57 = vpack.c.bf16 %v419_v54, %v417_v53  ;;  %v1721_v19 = vpack.c.bf16 %v467_v13, %v465_v5 }
  0xe5   :  { %v482_v59 = vpack.c.bf16 %v420_v56, %v418_v55  ;;  %v268_v60 = vpop.f32.mrb[4].mxu0  ;;  %v1723_v21 = vpack.c.bf16 %v468_v16, %v466_v10  ;;  %v388_v22 = vpop.f32.mrb[4].mxu1 }
  0xe6   :  { %v269_v63 = vadd.f32 %v268_v60, %v1702_v42  ;;  %v270_v0 = vpop.f32.mrb[5].mxu0  ;;  %v389_v25 = vadd.f32 %v388_v22, %v1702_v42  ;;  %v390_v26 = vpop.f32.mrb[5].mxu1 }
  0xe7   :  { %v271_v3 = vadd.f32 %v270_v0, %v1704_v43  ;;  %v272_v4 = vpop.f32.mrb[6].mxu0  ;;  %680 = vmatprep.mubr.bf16.mxu1 %v482_v59  ;;  %v391_v29 = vadd.f32 %v390_v26, %v1704_v43  ;;  %v392_v30 = vpop.f32.mrb[6].mxu1 }
  0xe8   :  { %v273_v8 = vadd.f32 %v272_v4, %v1702_v42  ;;  %v274_v9 = vpop.f32.mrb[7].mxu0  ;;  %681 = vmatmul.mubr.bf16.vlgmr.msra.gmra.mrb[16].mxu1 %v481_v57  ;;  %v421_v14 = vmax.f32 %v269_v63, 0.0  ;;  %v469_v33 = vmax.f32 %v389_v25, 0.0  ;;  %v393_v34 = vadd.f32 %v392_v30, %v1702_v42  ;;  %v394_v35 = vpop.f32.mrb[7].mxu1 }
  0xe9   :  { %v275_v12 = vadd.f32 %v274_v9, %v1704_v43  ;;  %v422_v17 = vmax.f32 %v271_v3, 0.0  ;;  %v470_v38 = vmax.f32 %v391_v29, 0.0  ;;  %v395_v39 = vadd.f32 %v394_v35, %v1704_v43 }
  0xea   :  { %v423_v15 = vmax.f32 %v273_v8, 0.0  ;;  %v471_v41 = vmax.f32 %v393_v34, 0.0 }
  0xeb   :  { %v424_v18 = vmax.f32 %v275_v12, 0.0  ;;  %v472_v46 = vmax.f32 %v395_v39, 0.0 }
  0xec   :  { %v483_v20 = vpack.c.bf16 %v423_v15, %v421_v14  ;;  %v1733_v49 = vpack.c.bf16 %v471_v41, %v469_v33 }
  0xed   :  { %v484_v23 = vpack.c.bf16 %v424_v18, %v422_v17  ;;  %v278_v24 = vpop.f32.mrb[8].mxu0  ;;  %v1735_v51 = vpack.c.bf16 %v472_v46, %v470_v38  ;;  %v398_v52 = vpop.f32.mrb[8].mxu1 }
  0xee   :  { %v279_v27 = vadd.f32 %v278_v24, %v1702_v42  ;;  %v280_v28 = vpop.f32.mrb[9].mxu0  ;;  %v399_v55 = vadd.f32 %v398_v52, %v1702_v42  ;;  %v400_v56 = vpop.f32.mrb[9].mxu1 }
  0xef   :  { %v281_v31 = vadd.f32 %v280_v28, %v1704_v43  ;;  %v282_v32 = vpop.f32.mrb[10].mxu0  ;;  %688 = vmatprep.mubr.bf16.mxu1 %v484_v23  ;;  %v401_v59 = vadd.f32 %v400_v56, %v1704_v43  ;;  %v402_v60 = vpop.f32.mrb[10].mxu1 }
  0xf0   :  { %v283_v36 = vadd.f32 %v282_v32, %v1702_v42  ;;  %v284_v37 = vpop.f32.mrb[11].mxu0  ;;  %689 = vmatmul.mubr.bf16.gmra.mrb[20].mxu1 %v483_v20  ;;  %v425_v44 = vmax.f32 %v279_v27, 0.0  ;;  %v473_v63 = vmax.f32 %v399_v55, 0.0  ;;  %v403_v0 = vadd.f32 %v402_v60, %v1702_v42  ;;  %v404_v1 = vpop.f32.mrb[11].mxu1 }
  0xf1   :  { %v285_v40 = vadd.f32 %v284_v37, %v1704_v43  ;;  %v426_v47 = vmax.f32 %v281_v31, 0.0  ;;  %v474_v4 = vmax.f32 %v401_v59, 0.0  ;;  %v405_v5 = vadd.f32 %v404_v1, %v1704_v43 }
  0xf2   :  { %v427_v45 = vmax.f32 %v283_v36, 0.0  ;;  %v475_v7 = vmax.f32 %v403_v0, 0.0 }
  0xf3   :  { %v428_v48 = vmax.f32 %v285_v40, 0.0  ;;  %v476_v10 = vmax.f32 %v405_v5, 0.0 }
  0xf4   :  { %v485_v50 = vpack.c.bf16 %v427_v45, %v425_v44  ;;  %v1745_v13 = vpack.c.bf16 %v475_v7, %v473_v63 }
  0xf5   :  { %v486_v53 = vpack.c.bf16 %v428_v48, %v426_v47  ;;  %v288_v54 = vpop.f32.mrb[12].mxu0  ;;  %v1747_v15 = vpack.c.bf16 %v476_v10, %v474_v4  ;;  %v408_v16 = vpop.f32.mrb[12].mxu1 }
  0xf6   :  { %v289_v57 = vadd.f32 %v288_v54, %v1702_v42  ;;  %v290_v58 = vpop.f32.mrb[13].mxu0  ;;  %v409_v20 = vadd.f32 %v408_v16, %v1702_v42  ;;  %v410_v22 = vpop.f32.mrb[13].mxu1 }
  0xf7   :  { %v291_v61 = vadd.f32 %v290_v58, %v1704_v43  ;;  %v292_v62 = vpop.f32.mrb[14].mxu0  ;;  %696 = vmatprep.mubr.bf16.mxu1 %v486_v53  ;;  %v411_v25 = vadd.f32 %v410_v22, %v1704_v43  ;;  %v412_v26 = vpop.f32.mrb[14].mxu1 }
  0xf8   :  { %v293_v2 = vadd.f32 %v292_v62, %v1702_v42  ;;  %v294_v3 = vpop.f32.mrb[15].mxu0  ;;  %697 = vmatmul.mubr.bf16.gmra.mrb[24].mxu1 %v485_v50  ;;  %v429_v8 = vmax.f32 %v289_v57, 0.0  ;;  %v477_v29 = vmax.f32 %v409_v20, 0.0  ;;  %v413_v30 = vadd.f32 %v412_v26, %v1702_v42  ;;  %v414_v31 = vpop.f32.mrb[15].mxu1 }
  0xf9   :  { %v295_v6 = vadd.f32 %v294_v3, %v1704_v43  ;;  %v430_v11 = vmax.f32 %v291_v61, 0.0  ;;  %v478_v34 = vmax.f32 %v411_v25, 0.0  ;;  %v415_v35 = vadd.f32 %v414_v31, %v1704_v43 }
  0xfa   :  { %v431_v9 = vmax.f32 %v293_v2, 0.0  ;;  %v479_v37 = vmax.f32 %v413_v30, 0.0 }
  0xfb   :  { %v432_v12 = vmax.f32 %v295_v6, 0.0  ;;  %v480_v40 = vmax.f32 %v415_v35, 0.0 }
  0xfc   :  { %v487_v14 = vpack.c.bf16 %v431_v9, %v429_v8  ;;  %v1757_v45 = vpack.c.bf16 %v479_v37, %v477_v29 }
  0xfd   :  { %v488_v17 = vpack.c.bf16 %v432_v12, %v430_v11  ;;  %v298_v18 = vpop.f32.mrb[16].mxu0  ;;  %v1759_v47 = vpack.c.bf16 %v480_v40, %v478_v34 }
  0xfe   :  { %v299_v23 = vadd.f32 %v298_v18, %v1702_v42  ;;  %v300_v24 = vpop.f32.mrb[17].mxu0 }
  0xff   :  { %v301_v27 = vadd.f32 %v300_v24, %v1704_v43  ;;  %v302_v28 = vpop.f32.mrb[18].mxu0  ;;  %704 = vmatprep.mubr.bf16.mxu1 %v488_v17 }
 0x100   :  { %v303_v32 = vadd.f32 %v302_v28, %v1702_v42  ;;  %v304_v33 = vpop.f32.mrb[19].mxu0  ;;  %705 = vmatmul.mubr.bf16.gmra.mrb[28].mxu1 %v487_v14  ;;  %v433_v38 = vmax.f32 %v299_v23, 0.0 }
 0x101   :  { %v305_v36 = vadd.f32 %v304_v33, %v1704_v43  ;;  %v434_v41 = vmax.f32 %v301_v27, 0.0 }
 0x102   :  { %v435_v39 = vmax.f32 %v303_v32, 0.0 }
 0x103   :  { %v436_v44 = vmax.f32 %v305_v36, 0.0 }
 0x104   :  { %v489_v46 = vpack.c.bf16 %v435_v39, %v433_v38 }
 0x105   :  { %v490_v48 = vpack.c.bf16 %v436_v44, %v434_v41  ;;  %v308_v50 = vpop.f32.mrb[20].mxu0 }
 0x106   :  { %v309_v52 = vadd.f32 %v308_v50, %v1702_v42  ;;  %v310_v53 = vpop.f32.mrb[21].mxu0 }
 0x107   :  { %v311_v54 = vadd.f32 %v310_v53, %v1704_v43  ;;  %v312_v55 = vpop.f32.mrb[22].mxu0  ;;  %712 = vmatprep.mubr.bf16.mxu1 %v490_v48 }
 0x108   :  { %v313_v56 = vadd.f32 %v312_v55, %v1702_v42  ;;  %v314_v57 = vpop.f32.mrb[23].mxu0  ;;  %713 = vmatmul.mubr.bf16.gmra.mrb[32].mxu1 %v489_v46  ;;  %v437_v59 = vmax.f32 %v309_v52, 0.0 }
 0x109   :  { %v315_v58 = vadd.f32 %v314_v57, %v1704_v43  ;;  %v438_v61 = vmax.f32 %v311_v54, 0.0 }
 0x10a   :  { %v439_v60 = vmax.f32 %v313_v56, 0.0 }
 0x10b   :  { %v440_v62 = vmax.f32 %v315_v58, 0.0 }
 0x10c   :  { %v491_v63 = vpack.c.bf16 %v439_v60, %v437_v59 }
 0x10d   :  { %v492_v0 = vpack.c.bf16 %v440_v62, %v438_v61  ;;  %v318_v1 = vpop.f32.mrb[24].mxu0 }
 0x10e   :  { %v319_v2 = vadd.f32 %v318_v1, %v1702_v42  ;;  %v320_v3 = vpop.f32.mrb[25].mxu0 }
 0x10f   :  { %v321_v4 = vadd.f32 %v320_v3, %v1704_v43  ;;  %v322_v5 = vpop.f32.mrb[26].mxu0  ;;  %720 = vmatprep.mubr.bf16.mxu1 %v492_v0 }
 0x110   :  { %v323_v6 = vadd.f32 %v322_v5, %v1702_v42  ;;  %v324_v7 = vpop.f32.mrb[27].mxu0  ;;  %721 = vmatmul.mubr.bf16.gmra.mrb[36].mxu1 %v491_v63  ;;  %v441_v9 = vmax.f32 %v319_v2, 0.0 }
 0x111   :  { %v325_v8 = vadd.f32 %v324_v7, %v1704_v43  ;;  %v442_v11 = vmax.f32 %v321_v4, 0.0 }
 0x112   :  { %v443_v10 = vmax.f32 %v323_v6, 0.0 }
 0x113   :  { %v444_v12 = vmax.f32 %v325_v8, 0.0 }
 0x114   :  { %v493_v14 = vpack.c.bf16 %v443_v10, %v441_v9 }
 0x115   :  { %v494_v16 = vpack.c.bf16 %v444_v12, %v442_v11  ;;  %v328_v17 = vpop.f32.mrb[28].mxu0 }
 0x116   :  { %v329_v18 = vadd.f32 %v328_v17, %v1702_v42  ;;  %v330_v20 = vpop.f32.mrb[29].mxu0 }
 0x117   :  { %v331_v22 = vadd.f32 %v330_v20, %v1704_v43  ;;  %v332_v23 = vpop.f32.mrb[30].mxu0  ;;  %728 = vmatprep.mubr.bf16.mxu1 %v494_v16 }
 0x118   :  { %v333_v24 = vadd.f32 %v332_v23, %v1702_v42  ;;  %v334_v25 = vpop.f32.mrb[31].mxu0  ;;  %729 = vmatmul.mubr.bf16.gmra.mrb[40].mxu1 %v493_v14  ;;  %v445_v27 = vmax.f32 %v329_v18, 0.0 }
 0x119   :  { %v335_v26 = vadd.f32 %v334_v25, %v1704_v43  ;;  %v446_v29 = vmax.f32 %v331_v22, 0.0 }
 0x11a   :  { %v447_v28 = vmax.f32 %v333_v24, 0.0 }
 0x11b   :  { %v448_v30 = vmax.f32 %v335_v26, 0.0 }
 0x11c   :  { %v495_v31 = vpack.c.bf16 %v447_v28, %v445_v27 }
 0x11d   :  { %v496_v32 = vpack.c.bf16 %v448_v30, %v446_v29  ;;  %v338_v33 = vpop.f32.mrb[32].mxu0 }
 0x11e   :  { %v339_v34 = vadd.f32 %v338_v33, %v1702_v42  ;;  %v340_v35 = vpop.f32.mrb[33].mxu0 }
 0x11f   :  { %v341_v36 = vadd.f32 %v340_v35, %v1704_v43  ;;  %v342_v37 = vpop.f32.mrb[34].mxu0  ;;  %736 = vmatprep.mubr.bf16.mxu1 %v496_v32 }
 0x120   :  { %v343_v38 = vadd.f32 %v342_v37, %v1702_v42  ;;  %v344_v39 = vpop.f32.mrb[35].mxu0  ;;  %737 = vmatmul.mubr.bf16.gmra.mrb[44].mxu1 %v495_v31  ;;  %v449_v41 = vmax.f32 %v339_v34, 0.0  ;;  %v1447_v34 = vld [vmem:[%s1992_s5 + $0x8] sm:$0xff]   ;;  %v1821_v37 = vld [vmem:[%s1993_s4] ss:$0 sm:$0xff] }
 0x121   :  { %v345_v40 = vadd.f32 %v344_v39, %v1704_v43  ;;  %v450_v46 = vmax.f32 %v341_v36, 0.0  ;;  %1357 = vmatprep.subr.bf16.mxu0 %v1447_v34  ;;  %v1450_v36 = vld [vmem:[%s1992_s5 + $0x20] sm:$0xff]  }
 0x122   :  { %v451_v44 = vmax.f32 %v343_v38, 0.0  ;;  %1358 = vmatpush3.bf16.msra.mxu0 %v1447_v34 }
 0x123   :  { %v452_v48 = vmax.f32 %v345_v40, 0.0 }
 0x124   :  { %v497_v50 = vpack.c.bf16 %v451_v44, %v449_v41 }
 0x125   :  { %v498_v52 = vpack.c.bf16 %v452_v48, %v450_v46  ;;  %v348_v53 = vpop.f32.mrb[36].mxu0 }
 0x126   :  { %v349_v54 = vadd.f32 %v348_v53, %v1702_v42  ;;  %v350_v55 = vpop.f32.mrb[37].mxu0 }
 0x127   :  { %v351_v56 = vadd.f32 %v350_v55, %v1704_v43  ;;  %v352_v57 = vpop.f32.mrb[38].mxu0  ;;  %744 = vmatprep.mubr.bf16.mxu1 %v498_v52 }
 0x128   :  { %v353_v58 = vadd.f32 %v352_v57, %v1702_v42  ;;  %v354_v59 = vpop.f32.mrb[39].mxu0  ;;  %745 = vmatmul.mubr.bf16.gmra.mrb[48].mxu1 %v497_v50  ;;  %v453_v61 = vmax.f32 %v349_v54, 0.0 }
 0x129   :  { %v355_v60 = vadd.f32 %v354_v59, %v1704_v43  ;;  %v454_v63 = vmax.f32 %v351_v56, 0.0 }
 0x12a   :  { %v455_v62 = vmax.f32 %v353_v58, 0.0 }
 0x12b   :  { %v456_v0 = vmax.f32 %v355_v60, 0.0 }
 0x12c   :  { %v499_v1 = vpack.c.bf16 %v455_v62, %v453_v61 }
 0x12d   :  { %v500_v2 = vpack.c.bf16 %v456_v0, %v454_v63  ;;  %v358_v3 = vpop.f32.mrb[40].mxu0 }
 0x12e   :  { %v359_v4 = vadd.f32 %v358_v3, %v1702_v42  ;;  %v360_v5 = vpop.f32.mrb[41].mxu0 }
 0x12f   :  { %v361_v6 = vadd.f32 %v360_v5, %v1704_v43  ;;  %v362_v7 = vpop.f32.mrb[42].mxu0  ;;  %752 = vmatprep.mubr.bf16.mxu1 %v500_v2 }
 0x130   :  { %v363_v8 = vadd.f32 %v362_v7, %v1702_v42  ;;  %v364_v9 = vpop.f32.mrb[43].mxu0  ;;  %753 = vmatmul.mubr.bf16.gmra.mrb[52].mxu1 %v499_v1  ;;  %v457_v11 = vmax.f32 %v359_v4, 0.0 }
 0x131   :  { %v365_v10 = vadd.f32 %v364_v9, %v1704_v43  ;;  %v458_v14 = vmax.f32 %v361_v6, 0.0 }
 0x132   :  { %v459_v12 = vmax.f32 %v363_v8, 0.0 }
 0x133   :  { %v460_v16 = vmax.f32 %v365_v10, 0.0 }
 0x134   :  { %v501_v17 = vpack.c.bf16 %v459_v12, %v457_v11 }
 0x135   :  { %v502_v18 = vpack.c.bf16 %v460_v16, %v458_v14  ;;  %v368_v20 = vpop.f32.mrb[44].mxu0 }
 0x136   :  { %v369_v22 = vadd.f32 %v368_v20, %v1702_v42  ;;  %v370_v23 = vpop.f32.mrb[45].mxu0 }
 0x137   :  { %v371_v24 = vadd.f32 %v370_v23, %v1704_v43  ;;  %v372_v25 = vpop.f32.mrb[46].mxu0  ;;  %760 = vmatprep.mubr.bf16.mxu1 %v502_v18 }
 0x138   :  { %v373_v26 = vadd.f32 %v372_v25, %v1702_v42  ;;  %v374_v27 = vpop.f32.mrb[47].mxu0  ;;  %761 = vmatmul.mubr.bf16.gmra.mrb[56].mxu1 %v501_v17  ;;  %v461_v29 = vmax.f32 %v369_v22, 0.0  ;;  %v1448_v42 = vld [vmem:[%s1992_s5 + $0x10] sm:$0xff]  }
 0x139   :  { %v375_v28 = vadd.f32 %v374_v27, %v1704_v43  ;;  %v462_v31 = vmax.f32 %v371_v24, 0.0  ;;  %1359 = vmatprep.subr.bf16.mxu0 %v1448_v42  ;;  %v1449_v43 = vld [vmem:[%s1992_s5 + $0x18] sm:$0xff]  }
 0x13a   :  { %v463_v30 = vmax.f32 %v373_v26, 0.0  ;;  %1360 = vmatpush3.bf16.msra.mxu0 %v1448_v42 }
 0x13b   :  { %v464_v32 = vmax.f32 %v375_v28, 0.0  ;;  %1361 = vmatprep.subr.bf16.mxu0 %v1449_v43 }
 0x13c   :  { %v503_v33 = vpack.c.bf16 %v463_v30, %v461_v29 }
 0x13d   :  { %v504_v35 = vpack.c.bf16 %v464_v32, %v462_v31 }
 0x13e   :  { %1362 = vmatpush3.bf16.msra.mxu0 %v1449_v43 }
 0x13f   :  { %768 = vmatprep.mubr.bf16.mxu1 %v504_v35  ;;  %1363 = vmatprep.subr.bf16.mxu0 %v1450_v36 }
 0x140   :  { %769 = vmatmul.mubr.bf16.gmra.mrb[60].mxu1 %v503_v33 }
 0x141   :  { %776 = vmatprep.mubr.bf16.mxu1 %v1723_v21  ;;  %v1451_v21 = vld [vmem:[%s1992_s5 + $0x28] sm:$0xff]  }
 0x142   :  { %1364 = vmatpush3.bf16.msra.mxu0 %v1450_v36 }
 0x143   :  { %1365 = vmatprep.subr.bf16.mxu0 %v1451_v21 }
 0x146   :  { %1366 = vmatpush3.bf16.msra.mxu0 %v1451_v21 }
 0x148   :  { %777 = vmatmul.mubr.bf16.gmra.mrb[64].mxu1 %v1721_v19  ;;  %v1452_v19 = vld [vmem:[%s1992_s5 + $0x30] sm:$0xff]  }
 0x149   :  { %784 = vmatprep.mubr.bf16.mxu1 %v1735_v51  ;;  %1367 = vmatprep.subr.bf16.mxu0 %v1452_v19  ;;  %v1453_v51 = vld [vmem:[%s1992_s5 + $0x38] sm:$0xff]  }
 0x14a   :  { %1368 = vmatpush3.bf16.msra.mxu0 %v1452_v19 }
 0x14b   :  { %1369 = vmatprep.subr.bf16.mxu0 %v1453_v51 }
 0x14e   :  { %1370 = vmatpush3.bf16.msra.mxu0 %v1453_v51 }
 0x150   :  { %785 = vmatmul.mubr.bf16.gmra.mrb[68].mxu1 %v1733_v49 }
 0x151   :  { %792 = vmatprep.mubr.bf16.mxu1 %v1747_v15 }
 0x158   :  { %793 = vmatmul.mubr.bf16.gmra.mrb[72].mxu1 %v1745_v13 }
 0x159   :  { %800 = vmatprep.mubr.bf16.mxu1 %v1759_v47 }
 0x160   :  { %801 = vmatmul.mubr.bf16.gmra.mrb[76].mxu1 %v1757_v45 }
 0x1bb   :  { %v1235_v49 = vpop.f32.mrb[16].mxu1 }
 0x1bc   :  { %v1236_v15 = vpop.f32.mrb[17].mxu1 }
 0x1bd   :  { %v1237_v38 = vadd.f32 %v1236_v15, %v1235_v49  ;;  %v1238_v39 = vpop.f32.mrb[18].mxu1 }
 0x1be   :  { %v1239_v40 = vpop.f32.mrb[19].mxu1 }
 0x1bf   :  { %v683_v41 = vadd.f32 %v1237_v38, %v1821_v37  ;;  %v1240_v44 = vadd.f32 %v1239_v40, %v1238_v39 }
 0x1c1   :  { %v809_v46 = vmax.f32 %v683_v41, 0.0  ;;  %v686_v13 = vadd.f32 %v1240_v44, %v1821_v37 }
 0x1c3   :  { %v810_v48 = vmax.f32 %v686_v13, 0.0  ;;  %v1241_v47 = vpop.f32.mrb[20].mxu1  ;;  %1454 = vtanh.f32 %v809_v46 }
 0x1c4   :  { %v1242_v45 = vpop.f32.mrb[21].mxu1 }
 0x1c5   :  { %1456 = vtanh.f32 %v810_v48  ;;  %v1243_v50 = vadd.f32 %v1242_v45, %v1241_v47  ;;  %v1244_v52 = vpop.f32.mrb[22].mxu1 }
 0x1c6   :  { %v1245_v53 = vpop.f32.mrb[23].mxu1 }
 0x1c7   :  { %v691_v54 = vadd.f32 %v1243_v50, %v1821_v37  ;;  %v1246_v55 = vadd.f32 %v1245_v53, %v1244_v52 }
 0x1c9   :  { %v811_v56 = vmax.f32 %v691_v54, 0.0  ;;  %v694_v57 = vadd.f32 %v1246_v55, %v1821_v37 }
 0x1cb   :  { %v812_v58 = vmax.f32 %v694_v57, 0.0  ;;  %v1247_v59 = vpop.f32.mrb[24].mxu1  ;;  %1458 = vtanh.f32 %v811_v56 }
 0x1cc   :  { %v1248_v60 = vpop.f32.mrb[25].mxu1 }
 0x1cd   :  { %1460 = vtanh.f32 %v812_v58  ;;  %v1249_v61 = vadd.f32 %v1248_v60, %v1247_v59  ;;  %v1250_v62 = vpop.f32.mrb[26].mxu1  ;;  %v1455_v63 = vpop.eup %1454 }
 0x1ce   :  { %v1251_v0 = vpop.f32.mrb[27].mxu1 }
 0x1cf   :  { %v1457_v1 = vpop.eup %1456  ;;  %v699_v2 = vadd.f32 %v1249_v61, %v1821_v37  ;;  %v1252_v3 = vadd.f32 %v1251_v0, %v1250_v62 }
 0x1d0   :  { %v873_v4 = vpack.c.bf16 %v1457_v1, %v1455_v63 }
 0x1d1   :  { %v813_v5 = vmax.f32 %v699_v2, 0.0  ;;  %v702_v6 = vadd.f32 %v1252_v3, %v1821_v37 }
 0x1d2   :  { %1371 = vmatprep.mubr.bf16.mxu0 %v873_v4 }
 0x1d3   :  { %v814_v7 = vmax.f32 %v702_v6, 0.0  ;;  %v1253_v8 = vpop.f32.mrb[28].mxu1  ;;  %1462 = vtanh.f32 %v813_v5 }
 0x1d4   :  { %v1254_v9 = vpop.f32.mrb[29].mxu1 }
 0x1d5   :  { %1464 = vtanh.f32 %v814_v7  ;;  %v1255_v10 = vadd.f32 %v1254_v9, %v1253_v8  ;;  %v1256_v11 = vpop.f32.mrb[30].mxu1  ;;  %v1459_v12 = vpop.eup %1458 }
 0x1d6   :  { %v1257_v14 = vpop.f32.mrb[31].mxu1 }
 0x1d7   :  { %v1461_v16 = vpop.eup %1460  ;;  %v707_v17 = vadd.f32 %v1255_v10, %v1821_v37  ;;  %v1258_v18 = vadd.f32 %v1257_v14, %v1256_v11 }
 0x1d8   :  { %v874_v20 = vpack.c.bf16 %v1461_v16, %v1459_v12 }
 0x1d9   :  { %v815_v22 = vmax.f32 %v707_v17, 0.0  ;;  %v710_v23 = vadd.f32 %v1258_v18, %v1821_v37 }
 0x1da   :  { %1372 = vmatmul.mubr.bf16.vlgmr.msra.gmra.mrb[48].mxu0 %v874_v20 }
 0x1db   :  { %v816_v24 = vmax.f32 %v710_v23, 0.0  ;;  %v1259_v25 = vpop.f32.mrb[32].mxu1  ;;  %1466 = vtanh.f32 %v815_v22 }
 0x1dc   :  { %v1260_v26 = vpop.f32.mrb[33].mxu1 }
 0x1dd   :  { %1468 = vtanh.f32 %v816_v24  ;;  %v1261_v27 = vadd.f32 %v1260_v26, %v1259_v25  ;;  %v1262_v28 = vpop.f32.mrb[34].mxu1  ;;  %v1463_v29 = vpop.eup %1462 }
 0x1de   :  { %v1263_v30 = vpop.f32.mrb[35].mxu1 }
 0x1df   :  { %v1465_v31 = vpop.eup %1464  ;;  %v715_v32 = vadd.f32 %v1261_v27, %v1821_v37  ;;  %v1264_v33 = vadd.f32 %v1263_v30, %v1262_v28 }
 0x1e0   :  { %v875_v34 = vpack.c.bf16 %v1465_v31, %v1463_v29 }
 0x1e1   :  { %v817_v35 = vmax.f32 %v715_v32, 0.0  ;;  %v718_v42 = vadd.f32 %v1264_v33, %v1821_v37 }
 0x1e2   :  { %1375 = vmatprep.mubr.bf16.mxu0 %v875_v34 }
 0x1e3   :  { %v818_v43 = vmax.f32 %v718_v42, 0.0  ;;  %v1265_v36 = vpop.f32.mrb[36].mxu1  ;;  %1470 = vtanh.f32 %v817_v35 }
 0x1e4   :  { %v1266_v21 = vpop.f32.mrb[37].mxu1 }
 0x1e5   :  { %1472 = vtanh.f32 %v818_v43  ;;  %v1267_v19 = vadd.f32 %v1266_v21, %v1265_v36  ;;  %v1268_v51 = vpop.f32.mrb[38].mxu1  ;;  %v1467_v49 = vpop.eup %1466 }
 0x1e6   :  { %v1269_v15 = vpop.f32.mrb[39].mxu1 }
 0x1e7   :  { %v1469_v38 = vpop.eup %1468  ;;  %v723_v39 = vadd.f32 %v1267_v19, %v1821_v37  ;;  %v1270_v40 = vadd.f32 %v1269_v15, %v1268_v51 }
 0x1e8   :  { %v876_v41 = vpack.c.bf16 %v1469_v38, %v1467_v49 }
 0x1e9   :  { %v819_v44 = vmax.f32 %v723_v39, 0.0  ;;  %v726_v46 = vadd.f32 %v1270_v40, %v1821_v37 }
 0x1ea   :  { %1376 = vmatmul.mubr.bf16.gmra.mrb[52].mxu0 %v876_v41 }
 0x1eb   :  { %v820_v13 = vmax.f32 %v726_v46, 0.0  ;;  %v1271_v48 = vpop.f32.mrb[40].mxu1  ;;  %1474 = vtanh.f32 %v819_v44 }
 0x1ec   :  { %v1272_v47 = vpop.f32.mrb[41].mxu1 }
 0x1ed   :  { %1476 = vtanh.f32 %v820_v13  ;;  %v1273_v45 = vadd.f32 %v1272_v47, %v1271_v48  ;;  %v1274_v50 = vpop.f32.mrb[42].mxu1  ;;  %v1471_v52 = vpop.eup %1470 }
 0x1ee   :  { %v1275_v53 = vpop.f32.mrb[43].mxu1 }
 0x1ef   :  { %v1473_v54 = vpop.eup %1472  ;;  %v731_v55 = vadd.f32 %v1273_v45, %v1821_v37  ;;  %v1276_v56 = vadd.f32 %v1275_v53, %v1274_v50 }
 0x1f0   :  { %v877_v57 = vpack.c.bf16 %v1473_v54, %v1471_v52 }
 0x1f1   :  { %v821_v58 = vmax.f32 %v731_v55, 0.0  ;;  %v734_v59 = vadd.f32 %v1276_v56, %v1821_v37 }
 0x1f2   :  { %1379 = vmatprep.mubr.bf16.mxu0 %v877_v57 }
 0x1f3   :  { %v822_v60 = vmax.f32 %v734_v59, 0.0  ;;  %v1277_v61 = vpop.f32.mrb[44].mxu1  ;;  %1478 = vtanh.f32 %v821_v58 }
 0x1f4   :  { %v1278_v62 = vpop.f32.mrb[45].mxu1 }
 0x1f5   :  { %1480 = vtanh.f32 %v822_v60  ;;  %v1279_v63 = vadd.f32 %v1278_v62, %v1277_v61  ;;  %v1280_v0 = vpop.f32.mrb[46].mxu1  ;;  %v1475_v1 = vpop.eup %1474 }
 0x1f6   :  { %v1281_v2 = vpop.f32.mrb[47].mxu1 }
 0x1f7   :  { %v1477_v3 = vpop.eup %1476  ;;  %v739_v4 = vadd.f32 %v1279_v63, %v1821_v37  ;;  %v1282_v5 = vadd.f32 %v1281_v2, %v1280_v0 }
 0x1f8   :  { %v878_v6 = vpack.c.bf16 %v1477_v3, %v1475_v1 }
 0x1f9   :  { %v823_v7 = vmax.f32 %v739_v4, 0.0  ;;  %v742_v8 = vadd.f32 %v1282_v5, %v1821_v37 }
 0x1fa   :  { %1380 = vmatmul.mubr.bf16.gmra.mrb[56].mxu0 %v878_v6 }
 0x1fb   :  { %v824_v9 = vmax.f32 %v742_v8, 0.0  ;;  %v1283_v10 = vpop.f32.mrb[48].mxu1  ;;  %1482 = vtanh.f32 %v823_v7 }
 0x1fc   :  { %v1284_v11 = vpop.f32.mrb[49].mxu1 }
 0x1fd   :  { %1484 = vtanh.f32 %v824_v9  ;;  %v1285_v12 = vadd.f32 %v1284_v11, %v1283_v10  ;;  %v1286_v14 = vpop.f32.mrb[50].mxu1  ;;  %v1479_v16 = vpop.eup %1478 }
 0x1fe   :  { %v1287_v17 = vpop.f32.mrb[51].mxu1 }
 0x1ff   :  { %v1481_v18 = vpop.eup %1480  ;;  %v747_v20 = vadd.f32 %v1285_v12, %v1821_v37  ;;  %v1288_v22 = vadd.f32 %v1287_v17, %v1286_v14 }
 0x200   :  { %v879_v23 = vpack.c.bf16 %v1481_v18, %v1479_v16 }
 0x201   :  { %v825_v24 = vmax.f32 %v747_v20, 0.0  ;;  %v750_v25 = vadd.f32 %v1288_v22, %v1821_v37 }
 0x202   :  { %1383 = vmatprep.mubr.bf16.mxu0 %v879_v23 }
 0x203   :  { %v826_v26 = vmax.f32 %v750_v25, 0.0  ;;  %v1289_v27 = vpop.f32.mrb[52].mxu1  ;;  %1486 = vtanh.f32 %v825_v24 }
 0x204   :  { %v1290_v28 = vpop.f32.mrb[53].mxu1 }
 0x205   :  { %1488 = vtanh.f32 %v826_v26  ;;  %v1291_v29 = vadd.f32 %v1290_v28, %v1289_v27  ;;  %v1292_v30 = vpop.f32.mrb[54].mxu1  ;;  %v1483_v31 = vpop.eup %1482 }
 0x206   :  { %v1293_v32 = vpop.f32.mrb[55].mxu1 }
 0x207   :  { %v1485_v33 = vpop.eup %1484  ;;  %v755_v34 = vadd.f32 %v1291_v29, %v1821_v37  ;;  %v1294_v35 = vadd.f32 %v1293_v32, %v1292_v30 }
 0x208   :  { %v880_v42 = vpack.c.bf16 %v1485_v33, %v1483_v31 }
 0x209   :  { %v827_v43 = vmax.f32 %v755_v34, 0.0  ;;  %v758_v36 = vadd.f32 %v1294_v35, %v1821_v37 }
 0x20a   :  { %1384 = vmatmul.mubr.bf16.gmra.mrb[60].mxu0 %v880_v42 }
 0x20b   :  { %v828_v21 = vmax.f32 %v758_v36, 0.0  ;;  %v1295_v19 = vpop.f32.mrb[56].mxu1  ;;  %1490 = vtanh.f32 %v827_v43 }
 0x20c   :  { %v1296_v51 = vpop.f32.mrb[57].mxu1 }
 0x20d   :  { %1492 = vtanh.f32 %v828_v21  ;;  %v1297_v49 = vadd.f32 %v1296_v51, %v1295_v19  ;;  %v1298_v15 = vpop.f32.mrb[58].mxu1  ;;  %v1487_v38 = vpop.eup %1486 }
 0x20e   :  { %v1299_v39 = vpop.f32.mrb[59].mxu1 }
 0x20f   :  { %v1489_v40 = vpop.eup %1488  ;;  %v763_v41 = vadd.f32 %v1297_v49, %v1821_v37  ;;  %v1300_v44 = vadd.f32 %v1299_v39, %v1298_v15 }
 0x210   :  { %v881_v46 = vpack.c.bf16 %v1489_v40, %v1487_v38 }
 0x211   :  { %v829_v13 = vmax.f32 %v763_v41, 0.0  ;;  %v766_v48 = vadd.f32 %v1300_v44, %v1821_v37 }
 0x212   :  { %1387 = vmatprep.mubr.bf16.mxu0 %v881_v46 }
 0x213   :  { %v830_v47 = vmax.f32 %v766_v48, 0.0  ;;  %v1301_v45 = vpop.f32.mrb[60].mxu1  ;;  %1494 = vtanh.f32 %v829_v13 }
 0x214   :  { %v1302_v50 = vpop.f32.mrb[61].mxu1 }
 0x215   :  { %1496 = vtanh.f32 %v830_v47  ;;  %v1303_v52 = vadd.f32 %v1302_v50, %v1301_v45  ;;  %v1304_v53 = vpop.f32.mrb[62].mxu1  ;;  %v1491_v54 = vpop.eup %1490 }
 0x216   :  { %v1305_v55 = vpop.f32.mrb[63].mxu1 }
 0x217   :  { %v1493_v56 = vpop.eup %1492  ;;  %v771_v57 = vadd.f32 %v1303_v52, %v1821_v37  ;;  %v1306_v58 = vadd.f32 %v1305_v55, %v1304_v53 }
 0x218   :  { %v882_v59 = vpack.c.bf16 %v1493_v56, %v1491_v54 }
 0x219   :  { %v831_v60 = vmax.f32 %v771_v57, 0.0  ;;  %v774_v61 = vadd.f32 %v1306_v58, %v1821_v37  ;;  %v1858_v58 = vld [vmem:[%s1994_s6] ss:$0 sm:$0xff] }
 0x21a   :  { %1388 = vmatmul.mubr.bf16.gmra.mrb[64].mxu0 %v882_v59 }
 0x21b   :  { %v832_v62 = vmax.f32 %v774_v61, 0.0  ;;  %v1307_v63 = vpop.f32.mrb[64].mxu1  ;;  %1498 = vtanh.f32 %v831_v60 }
 0x21c   :  { %v1308_v0 = vpop.f32.mrb[65].mxu1 }
 0x21d   :  { %1500 = vtanh.f32 %v832_v62  ;;  %v1309_v1 = vadd.f32 %v1308_v0, %v1307_v63  ;;  %v1310_v2 = vpop.f32.mrb[66].mxu1  ;;  %v1495_v3 = vpop.eup %1494 }
 0x21e   :  { %v1311_v4 = vpop.f32.mrb[67].mxu1 }
 0x21f   :  { %v1497_v5 = vpop.eup %1496  ;;  %v779_v6 = vadd.f32 %v1309_v1, %v1821_v37  ;;  %v1312_v7 = vadd.f32 %v1311_v4, %v1310_v2 }
 0x220   :  { %v883_v8 = vpack.c.bf16 %v1497_v5, %v1495_v3 }
 0x221   :  { %v833_v9 = vmax.f32 %v779_v6, 0.0  ;;  %v782_v10 = vadd.f32 %v1312_v7, %v1821_v37 }
 0x222   :  { %1391 = vmatprep.mubr.bf16.mxu0 %v883_v8 }
 0x223   :  { %v834_v11 = vmax.f32 %v782_v10, 0.0  ;;  %v1313_v12 = vpop.f32.mrb[68].mxu1  ;;  %1502 = vtanh.f32 %v833_v9 }
 0x224   :  { %v1314_v14 = vpop.f32.mrb[69].mxu1 }
 0x225   :  { %1504 = vtanh.f32 %v834_v11  ;;  %v1315_v16 = vadd.f32 %v1314_v14, %v1313_v12  ;;  %v1316_v17 = vpop.f32.mrb[70].mxu1  ;;  %v1499_v18 = vpop.eup %1498 }
 0x226   :  { %v1317_v20 = vpop.f32.mrb[71].mxu1 }
 0x227   :  { %v1501_v22 = vpop.eup %1500  ;;  %v787_v23 = vadd.f32 %v1315_v16, %v1821_v37  ;;  %v1318_v24 = vadd.f32 %v1317_v20, %v1316_v17 }
 0x228   :  { %v884_v25 = vpack.c.bf16 %v1501_v22, %v1499_v18 }
 0x229   :  { %v835_v26 = vmax.f32 %v787_v23, 0.0  ;;  %v790_v27 = vadd.f32 %v1318_v24, %v1821_v37 }
 0x22a   :  { %1392 = vmatmul.mubr.bf16.gmra.mrb[68].mxu0 %v884_v25 }
 0x22b   :  { %v836_v28 = vmax.f32 %v790_v27, 0.0  ;;  %v1319_v29 = vpop.f32.mrb[72].mxu1  ;;  %1506 = vtanh.f32 %v835_v26 }
 0x22c   :  { %v1320_v30 = vpop.f32.mrb[73].mxu1 }
 0x22d   :  { %1508 = vtanh.f32 %v836_v28  ;;  %v1321_v31 = vadd.f32 %v1320_v30, %v1319_v29  ;;  %v1322_v32 = vpop.f32.mrb[74].mxu1  ;;  %v1503_v33 = vpop.eup %1502 }
 0x22e   :  { %v1323_v34 = vpop.f32.mrb[75].mxu1 }
 0x22f   :  { %v1505_v35 = vpop.eup %1504  ;;  %v795_v42 = vadd.f32 %v1321_v31, %v1821_v37  ;;  %v1324_v43 = vadd.f32 %v1323_v34, %v1322_v32 }
 0x230   :  { %v885_v36 = vpack.c.bf16 %v1505_v35, %v1503_v33 }
 0x231   :  { %v837_v21 = vmax.f32 %v795_v42, 0.0  ;;  %v798_v19 = vadd.f32 %v1324_v43, %v1821_v37 }
 0x232   :  { %1395 = vmatprep.mubr.bf16.mxu0 %v885_v36 }
 0x233   :  { %v838_v51 = vmax.f32 %v798_v19, 0.0  ;;  %v1325_v49 = vpop.f32.mrb[76].mxu1  ;;  %1510 = vtanh.f32 %v837_v21 }
 0x234   :  { %v1326_v15 = vpop.f32.mrb[77].mxu1 }
 0x235   :  { %1512 = vtanh.f32 %v838_v51  ;;  %v1327_v38 = vadd.f32 %v1326_v15, %v1325_v49  ;;  %v1328_v39 = vpop.f32.mrb[78].mxu1  ;;  %v1507_v40 = vpop.eup %1506 }
 0x236   :  { %v1329_v41 = vpop.f32.mrb[79].mxu1 }
 0x237   :  { %v1509_v44 = vpop.eup %1508  ;;  %v803_v46 = vadd.f32 %v1327_v38, %v1821_v37  ;;  %v1330_v13 = vadd.f32 %v1329_v41, %v1328_v39 }
 0x238   :  { %v886_v48 = vpack.c.bf16 %v1509_v44, %v1507_v40 }
 0x239   :  { %v839_v47 = vmax.f32 %v803_v46, 0.0  ;;  %v806_v45 = vadd.f32 %v1330_v13, %v1821_v37 }
 0x23a   :  { %1396 = vmatmul.mubr.bf16.gmra.mrb[72].mxu0 %v886_v48 }
 0x23b   :  { %v840_v50 = vmax.f32 %v806_v45, 0.0  ;;  %1514 = vtanh.f32 %v839_v47 }
 0x23d   :  { %1516 = vtanh.f32 %v840_v50  ;;  %v1511_v52 = vpop.eup %1510 }
 0x23f   :  { %v1513_v53 = vpop.eup %1512 }
 0x240   :  { %v887_v54 = vpack.c.bf16 %v1513_v53, %v1511_v52 }
 0x242   :  { %1399 = vmatprep.mubr.bf16.mxu0 %v887_v54 }
 0x245   :  { %v1515_v55 = vpop.eup %1514 }
 0x247   :  { %v1517_v56 = vpop.eup %1516 }
 0x248   :  { %v888_v57 = vpack.c.bf16 %v1517_v56, %v1515_v55 }
 0x24a   :  { %1400 = vmatmul.mubr.bf16.gmra.mrb[76].mxu0 %v888_v57 }
 0x2ad   :  { %v1373_v59 = vpop.f32.mrb[48].mxu0 }
 0x2ae   :  { %v1003_v37 = vadd.f32 %v1373_v59, %v1858_v58  ;;  %v994_v60 = vpop.f32.mrb[49].mxu0 }
 0x2af   :  { %v995_v61 = vadd.f32 %v1858_v58, %v994_v60  ;;  %v1374_v62 = vpop.f32.mrb[50].mxu0 }
 0x2b0   :  { %1123 = vst [vmem:[%s1995_s7 + $0x10] sm:$0xff] %v1003_v37  ;;  %v1006_v63 = vadd.f32 %v1374_v62, %v1858_v58  ;;  %v997_v0 = vpop.f32.mrb[51].mxu0 }
 0x2b1   :  { %1121 = vst [vmem:[%s1995_s7] sm:$0xff] %v995_v61  ;;  %v998_v1 = vadd.f32 %v1858_v58, %v997_v0 }
 0x2b2   :  { %1124 = vst [vmem:[%s1995_s7 + $0x18] sm:$0xff] %v1006_v63 }
 0x2b3   :  { %1122 = vst [vmem:[%s1995_s7 + $0x8] sm:$0xff] %v998_v1 }
 0x2bd   :  { %v1377_v2 = vpop.f32.mrb[52].mxu0 }
 0x2be   :  { %v1019_v3 = vadd.f32 %v1377_v2, %v1858_v58  ;;  %v1010_v4 = vpop.f32.mrb[53].mxu0 }
 0x2bf   :  { %v1011_v5 = vadd.f32 %v1858_v58, %v1010_v4  ;;  %v1378_v6 = vpop.f32.mrb[54].mxu0 }
 0x2c0   :  { %1127 = vst [vmem:[%s1995_s7 + $0x30] sm:$0xff] %v1019_v3  ;;  %v1022_v7 = vadd.f32 %v1378_v6, %v1858_v58  ;;  %v1013_v8 = vpop.f32.mrb[55].mxu0 }
 0x2c1   :  { %1125 = vst [vmem:[%s1995_s7 + $0x20] sm:$0xff] %v1011_v5  ;;  %v1014_v9 = vadd.f32 %v1858_v58, %v1013_v8 }
 0x2c2   :  { %1128 = vst [vmem:[%s1995_s7 + $0x38] sm:$0xff] %v1022_v7 }
 0x2c3   :  { %1126 = vst [vmem:[%s1995_s7 + $0x28] sm:$0xff] %v1014_v9 }
 0x2cd   :  { %v1381_v10 = vpop.f32.mrb[56].mxu0 }
 0x2ce   :  { %v1035_v11 = vadd.f32 %v1381_v10, %v1858_v58  ;;  %v1026_v12 = vpop.f32.mrb[57].mxu0 }
 0x2cf   :  { %v1027_v14 = vadd.f32 %v1858_v58, %v1026_v12  ;;  %v1382_v16 = vpop.f32.mrb[58].mxu0 }
 0x2d0   :  { %1131 = vst [vmem:[%s1995_s7 + $0x50] sm:$0xff] %v1035_v11  ;;  %v1038_v17 = vadd.f32 %v1382_v16, %v1858_v58  ;;  %v1029_v18 = vpop.f32.mrb[59].mxu0 }
 0x2d1   :  { %1129 = vst [vmem:[%s1995_s7 + $0x40] sm:$0xff] %v1027_v14  ;;  %v1030_v20 = vadd.f32 %v1858_v58, %v1029_v18 }
 0x2d2   :  { %1132 = vst [vmem:[%s1995_s7 + $0x58] sm:$0xff] %v1038_v17 }
 0x2d3   :  { %1130 = vst [vmem:[%s1995_s7 + $0x48] sm:$0xff] %v1030_v20 }
 0x2dd   :  { %v1385_v22 = vpop.f32.mrb[60].mxu0 }
 0x2de   :  { %v1051_v23 = vadd.f32 %v1385_v22, %v1858_v58  ;;  %v1042_v24 = vpop.f32.mrb[61].mxu0 }
 0x2df   :  { %v1043_v25 = vadd.f32 %v1858_v58, %v1042_v24  ;;  %v1386_v26 = vpop.f32.mrb[62].mxu0 }
 0x2e0   :  { %1135 = vst [vmem:[%s1995_s7 + $0x70] sm:$0xff] %v1051_v23  ;;  %v1054_v27 = vadd.f32 %v1386_v26, %v1858_v58  ;;  %v1045_v28 = vpop.f32.mrb[63].mxu0 }
 0x2e1   :  { %1133 = vst [vmem:[%s1995_s7 + $0x60] sm:$0xff] %v1043_v25  ;;  %v1046_v29 = vadd.f32 %v1858_v58, %v1045_v28 }
 0x2e2   :  { %1136 = vst [vmem:[%s1995_s7 + $0x78] sm:$0xff] %v1054_v27 }
 0x2e3   :  { %1134 = vst [vmem:[%s1995_s7 + $0x68] sm:$0xff] %v1046_v29 }
 0x2ed   :  { %v1389_v30 = vpop.f32.mrb[64].mxu0 }
 0x2ee   :  { %v1067_v31 = vadd.f32 %v1389_v30, %v1858_v58  ;;  %v1058_v32 = vpop.f32.mrb[65].mxu0 }
 0x2ef   :  { %v1059_v33 = vadd.f32 %v1858_v58, %v1058_v32  ;;  %v1390_v34 = vpop.f32.mrb[66].mxu0 }
 0x2f0   :  { %1139 = vst [vmem:[%s1995_s7 + $0x90] sm:$0xff] %v1067_v31  ;;  %v1070_v35 = vadd.f32 %v1390_v34, %v1858_v58  ;;  %v1061_v42 = vpop.f32.mrb[67].mxu0 }
 0x2f1   :  { %1137 = vst [vmem:[%s1995_s7 + $0x80] sm:$0xff] %v1059_v33  ;;  %v1062_v43 = vadd.f32 %v1858_v58, %v1061_v42 }
 0x2f2   :  { %1140 = vst [vmem:[%s1995_s7 + $0x98] sm:$0xff] %v1070_v35 }
 0x2f3   :  { %1138 = vst [vmem:[%s1995_s7 + $0x88] sm:$0xff] %v1062_v43 }
 0x2fd   :  { %v1393_v36 = vpop.f32.mrb[68].mxu0 }
 0x2fe   :  { %v1083_v21 = vadd.f32 %v1393_v36, %v1858_v58  ;;  %v1074_v19 = vpop.f32.mrb[69].mxu0 }
 0x2ff   :  { %v1075_v51 = vadd.f32 %v1858_v58, %v1074_v19  ;;  %v1394_v49 = vpop.f32.mrb[70].mxu0 }
 0x300   :  { %1143 = vst [vmem:[%s1995_s7 + $0xb0] sm:$0xff] %v1083_v21  ;;  %v1086_v15 = vadd.f32 %v1394_v49, %v1858_v58  ;;  %v1077_v38 = vpop.f32.mrb[71].mxu0 }
 0x301   :  { %1141 = vst [vmem:[%s1995_s7 + $0xa0] sm:$0xff] %v1075_v51  ;;  %v1078_v39 = vadd.f32 %v1858_v58, %v1077_v38 }
 0x302   :  { %1144 = vst [vmem:[%s1995_s7 + $0xb8] sm:$0xff] %v1086_v15 }
 0x303   :  { %1142 = vst [vmem:[%s1995_s7 + $0xa8] sm:$0xff] %v1078_v39 }
 0x30d   :  { %v1397_v40 = vpop.f32.mrb[72].mxu0 }
 0x30e   :  { %v1099_v41 = vadd.f32 %v1397_v40, %v1858_v58  ;;  %v1090_v44 = vpop.f32.mrb[73].mxu0 }
 0x30f   :  { %v1091_v46 = vadd.f32 %v1858_v58, %v1090_v44  ;;  %v1398_v13 = vpop.f32.mrb[74].mxu0 }
 0x310   :  { %1147 = vst [vmem:[%s1995_s7 + $0xd0] sm:$0xff] %v1099_v41  ;;  %v1102_v48 = vadd.f32 %v1398_v13, %v1858_v58  ;;  %v1093_v47 = vpop.f32.mrb[75].mxu0 }
 0x311   :  { %1145 = vst [vmem:[%s1995_s7 + $0xc0] sm:$0xff] %v1091_v46  ;;  %v1094_v45 = vadd.f32 %v1858_v58, %v1093_v47 }
 0x312   :  { %1148 = vst [vmem:[%s1995_s7 + $0xd8] sm:$0xff] %v1102_v48 }
 0x313   :  { %1146 = vst [vmem:[%s1995_s7 + $0xc8] sm:$0xff] %v1094_v45 }
 0x31d   :  { %v1401_v50 = vpop.f32.mrb[76].mxu0 }
 0x31e   :  { %v1115_v52 = vadd.f32 %v1401_v50, %v1858_v58  ;;  %v1106_v53 = vpop.f32.mrb[77].mxu0 }
 0x31f   :  { %v1107_v54 = vadd.f32 %v1858_v58, %v1106_v53  ;;  %v1402_v55 = vpop.f32.mrb[78].mxu0 }
 0x320   :  { %1151 = vst [vmem:[%s1995_s7 + $0xf0] sm:$0xff] %v1115_v52  ;;  %v1118_v56 = vadd.f32 %v1402_v55, %v1858_v58  ;;  %v1109_v57 = vpop.f32.mrb[79].mxu0 }
 0x321   :  { %1149 = vst [vmem:[%s1995_s7 + $0xe0] sm:$0xff] %v1107_v54  ;;  %v1110_v59 = vadd.f32 %v1858_v58, %v1109_v57 }
 0x322   :  { %1152 = vst [vmem:[%s1995_s7 + $0xf8] sm:$0xff] %v1118_v56 }
 0x323   :  { %1150 = vst [vmem:[%s1995_s7 + $0xe8] sm:$0xff] %v1110_v59 }

</bundles_post_ra>
